<compile_context>
chip_gen: v7x
topology: tpu7x:2x2x1
jax: 0.10.0
libtpu: 0.0.40
codegen_flags: <defaults>
</compile_context>

<pallas_src>
import jax
import jax.numpy as jnp
from jax.experimental import pallas as pl
from jax.experimental.pallas import tpu as pltpu


def _disc_kernel(x_ref, w0_ref, b0_ref, w1_ref, b1_ref, w2_ref, b2_ref, o_ref):
    """One batch tile: x (emb, tile_n) -> sigmoid row (1, tile_n). Batch stays on lanes."""
    # Layer 0: (hid, emb) @ (emb, tile_n) -> (hid, tile_n), f32 accumulate on the MXU.
    h = jnp.dot(w0_ref[...], x_ref[...],
                preferred_element_type=jnp.float32) + b0_ref[...]
    h = jnp.where(h > 0, h, 0.2 * h)                 # LeakyReLU(0.2), f32 on the VPU

    # Layer 1: (hid, hid) @ (hid, tile_n)
    h = jnp.dot(w1_ref[...], h.astype(w1_ref.dtype),
                preferred_element_type=jnp.float32) + b1_ref[...]
    h = jnp.where(h > 0, h, 0.2 * h)

    # Layer 2: hid -> 1 as VPU multiply + sublane reduce; lane-dense (1, tile_n) row.
    logits = jnp.sum(h * w2_ref[...], axis=0, keepdims=True) + b2_ref[0, 0]
    o_ref[...] = jax.nn.sigmoid(logits).astype(o_ref.dtype)


def _choose_tile_n(n):
    """Small N: one round_up(N,128) tile. Big N: largest tile that keeps >= 2 grid steps
    (so v7x's two TensorCores both get work); per-step overhead dominates otherwise."""
    if n <= 128:
        return 128
    for cand in (4096, 2048, 1024, 512, 256, 128):
        if pl.cdiv(n, cand) >= 2:
            return cand
    return 128


def discriminator_forward(x, params, *, tile_n=None, compute_dtype=jnp.bfloat16):
    """x: (N, emb_dim). params in PyTorch nn.Linear layout:
       (w0 (hid,emb), b0 (hid,), w1 (hid,hid), b1 (hid,), w2 (1,hid), b2 (1,)).
       Returns (N,) float32, matching .view(-1)."""
    w0, b0, w1, b1, w2, b2 = params
    n, emb_dim = x.shape
    hid = w0.shape[0]

    if tile_n is None:
        tile_n = _choose_tile_n(n)
    num_tiles = pl.cdiv(n, tile_n)
    n_pad = num_tiles * tile_n

    # Lane-dense input: (emb, N). Transpose + cast (+ pad only if ragged) fuse into a
    # single copy pass; callers that already hold x as bf16 (emb, N) skip it entirely.
    x_t = x.T.astype(compute_dtype)
    if n_pad != n:
        x_t = jnp.pad(x_t, ((0, 0), (0, n_pad - n)))

    # bf16 matmul operands; f32 biases / final-layer column (tiny).
    w0c = w0.astype(compute_dtype)
    w1c = w1.astype(compute_dtype)
    b0c = b0.reshape(hid, 1).astype(jnp.float32)
    b1c = b1.reshape(hid, 1).astype(jnp.float32)
    w2c = w2.reshape(hid, 1).astype(jnp.float32)
    b2c = b2.reshape(1, 1).astype(jnp.float32)

    itemsize = jnp.dtype(compute_dtype).itemsize
    weight_bytes = (hid * emb_dim + hid * hid) * itemsize + (3 * hid + 1) * 4
    # Double-buffered x/out tiles + (conservatively) double-buffered resident weights
    # + slack for f32 temporaries. Only bites for MUSE's real hid=2048 on v5e's 16 MiB
    # default scoped limit; capped at v7x's 64 MiB physical VMEM.
    vmem_need = 2 * weight_bytes + 2 * (emb_dim * tile_n * itemsize + tile_n * 4) \
        + 4 * hid * tile_n + (2 << 20)
    vmem_limit = int(min(max(vmem_need, 32 << 20), 64 << 20))

    flops = 2 * n_pad * (hid * emb_dim + hid * hid + hid)
    bytes_accessed = n_pad * emb_dim * itemsize + weight_bytes + n_pad * 4

    out_row = pl.pallas_call(
        _disc_kernel,
        out_shape=jax.ShapeDtypeStruct((1, n_pad), jnp.float32),
        grid=(num_tiles,),
        in_specs=[
            pl.BlockSpec((emb_dim, tile_n), lambda i: (0, i)),      # x tile, lane-dense
            pl.BlockSpec((hid, emb_dim), lambda i: (0, 0)),         # W0, VMEM-resident
            pl.BlockSpec((hid, 1), lambda i: (0, 0)),               # b0
            pl.BlockSpec((hid, hid), lambda i: (0, 0)),             # W1, VMEM-resident
            pl.BlockSpec((hid, 1), lambda i: (0, 0)),               # b1
            pl.BlockSpec((hid, 1), lambda i: (0, 0)),               # w2 column
            pl.BlockSpec((1, 1), lambda i: (0, 0),
                         memory_space=pltpu.MemorySpace.SMEM),      # b2 scalar in SMEM
        ],
        out_specs=pl.BlockSpec((1, tile_n), lambda i: (0, i)),      # lane-dense output row
        compiler_params=pltpu.CompilerParams(
            dimension_semantics=("parallel",),
            vmem_limit_bytes=vmem_limit),
        cost_estimate=pl.CostEstimate(
            flops=flops, transcendentals=n_pad, bytes_accessed=bytes_accessed),
    )(x_t, w0c, b0c, w1c, b1c, w2c, b2c)

    # Padded lanes hold garbage sigmoid values; slice them off here.
    return out_row.reshape(-1)[:n]


def init_params(key, emb_dim, hid_dim):
    """Deterministic init, PyTorch nn.Linear layout: W is (out_dim, in_dim)."""
    ks = jax.random.split(key, 6)
    # dis_layers = 2  =>  3 linear layers: emb->hid, hid->hid, hid->1
    w0 = jax.random.normal(ks[0], (hid_dim, emb_dim), jnp.float32) * 0.05
    b0 = jax.random.normal(ks[1], (hid_dim,), jnp.float32) * 0.01
    w1 = jax.random.normal(ks[2], (hid_dim, hid_dim), jnp.float32) * 0.05
    b1 = jax.random.normal(ks[3], (hid_dim,), jnp.float32) * 0.01
    w2 = jax.random.normal(ks[4], (1, hid_dim), jnp.float32) * 0.05
    b2 = jax.random.normal(ks[5], (1,), jnp.float32) * 0.01
    return (w0, b0, w1, b1, w2, b2)


def reference_forward(x, params, compute_dtype=jnp.bfloat16):
    """Pure-JAX reference (eval-mode dropout = identity)."""
    w0, b0, w1, b1, w2, b2 = params
    cd = compute_dtype
    h = jnp.dot(w0.astype(cd), x.T.astype(cd),
                preferred_element_type=jnp.float32) + b0[:, None]
    h = jnp.where(h > 0, h, 0.2 * h)
    h = jnp.dot(w1.astype(cd), h.astype(cd),
                preferred_element_type=jnp.float32) + b1[:, None]
    h = jnp.where(h > 0, h, 0.2 * h)
    logits = jnp.sum(h * w2.reshape(-1, 1), axis=0) + b2.reshape(())
    return jax.nn.sigmoid(logits)                    # (N,)


if __name__ == "__main__":
    # Small config consistent with the module: emb_dim_autoenc=32, dis_layers=2,
    # dis_hid_dim=64. Two batch sizes: N=8 (single padded tile) and N=300 (multi-tile,
    # ragged last tile) to cover both grid paths.
    EMB_DIM, HID_DIM = 32, 64

    key = jax.random.PRNGKey(0)
    k_x, k_p = jax.random.split(key)
    params = init_params(k_p, EMB_DIM, HID_DIM)

    for n in (8, 300):
        x = jax.random.normal(jax.random.fold_in(k_x, n), (n, EMB_DIM), jnp.float32)
        out = jax.block_until_ready(discriminator_forward(x, params))

        ref_bf16 = reference_forward(x, params, compute_dtype=jnp.bfloat16)
        ref_f32 = reference_forward(x, params, compute_dtype=jnp.float32)

        assert out.shape == (n,), out.shape
        assert jnp.allclose(out, ref_bf16, atol=1e-3, rtol=1e-3), (out, ref_bf16)
        assert jnp.allclose(out, ref_f32, atol=5e-3, rtol=5e-3), (out, ref_f32)

    print("KERNEL_OK")
</pallas_src>

<mosaic_0001>
module attributes {stable_mosaic.version = 11 : i64} {
  func.func @_disc_kernel(%arg0: i32, %arg1: memref<32x128xbf16, #tpu.memory_space<vmem>>, %arg2: memref<64x32xbf16, #tpu.memory_space<vmem>>, %arg3: memref<64x1xf32, #tpu.memory_space<vmem>>, %arg4: memref<64x64xbf16, #tpu.memory_space<vmem>>, %arg5: memref<64x1xf32, #tpu.memory_space<vmem>>, %arg6: memref<64x1xf32, #tpu.memory_space<vmem>>, %arg7: memref<1x1xf32, #tpu.memory_space<smem>>, %arg8: memref<1x128xf32, #tpu.memory_space<vmem>>) attributes {dimension_semantics = [#tpu.dimension_semantics<parallel>], iteration_bounds = array<i64: 1>, scalar_prefetch = 0 : i64, scratch_operands = 0 : i64, tpu.core_type = #tpu.core_type<tc>, window_params = [{transform_indices = @transform_0, window_bounds = array<i64: 32, 128>}, {pipeline_mode = #tpu.pipeline_mode<synchronous>, transform_indices = @transform_1, window_bounds = array<i64: 64, 32>}, {pipeline_mode = #tpu.pipeline_mode<synchronous>, transform_indices = @transform_2, window_bounds = array<i64: 64, 1>}, {pipeline_mode = #tpu.pipeline_mode<synchronous>, transform_indices = @transform_3, window_bounds = array<i64: 64, 64>}, {pipeline_mode = #tpu.pipeline_mode<synchronous>, transform_indices = @transform_4, window_bounds = array<i64: 64, 1>}, {pipeline_mode = #tpu.pipeline_mode<synchronous>, transform_indices = @transform_5, window_bounds = array<i64: 64, 1>}, {transform_indices = @transform_6, window_bounds = array<i64: 1, 1>}, {transform_indices = @transform_7, window_bounds = array<i64: 1, 128>}]} {
    %c0 = arith.constant 0 : index
    %c0_0 = arith.constant 0 : index
    %0 = vector.load %arg2[%c0, %c0_0] : memref<64x32xbf16, #tpu.memory_space<vmem>>, vector<64x32xbf16>
    %c0_1 = arith.constant 0 : index
    %c0_2 = arith.constant 0 : index
    %1 = vector.load %arg1[%c0_1, %c0_2] : memref<32x128xbf16, #tpu.memory_space<vmem>>, vector<32x128xbf16>
    %cst = arith.constant dense<0.000000e+00> : vector<64x128xf32>
    %2 = tpu.matmul %0, %1, %cst {dimension_numbers = #tpu.dot_dimension_numbers<[1], [0], [0], [1], [0, 0, 1, 1], [], []>} : vector<64x32xbf16>, vector<32x128xbf16>, vector<64x128xf32> -> vector<64x128xf32>
    %c0_3 = arith.constant 0 : index
    %c0_4 = arith.constant 0 : index
    %3 = vector.load %arg3[%c0_3, %c0_4] : memref<64x1xf32, #tpu.memory_space<vmem>>, vector<64x1xf32>
    %4 = vector.broadcast %3 : vector<64x1xf32> to vector<64x128xf32>
    %5 = arith.addf %2, %4 : vector<64x128xf32>
    %cst_5 = arith.constant 0.000000e+00 : f32
    %6 = vector.broadcast %cst_5 : f32 to vector<64x128xf32>
    %7 = arith.cmpf ogt, %5, %6 : vector<64x128xf32>
    %cst_6 = arith.constant 2.000000e-01 : f32
    %8 = vector.broadcast %cst_6 : f32 to vector<64x128xf32>
    %9 = arith.mulf %8, %5 : vector<64x128xf32>
    %10 = arith.select %7, %5, %9 : vector<64x128xi1>, vector<64x128xf32>
    %c0_7 = arith.constant 0 : index
    %c0_8 = arith.constant 0 : index
    %11 = vector.load %arg4[%c0_7, %c0_8] : memref<64x64xbf16, #tpu.memory_space<vmem>>, vector<64x64xbf16>
    %12 = arith.truncf %10 : vector<64x128xf32> to vector<64x128xbf16>
    %cst_9 = arith.constant dense<0.000000e+00> : vector<64x128xf32>
    %13 = tpu.matmul %11, %12, %cst_9 {dimension_numbers = #tpu.dot_dimension_numbers<[1], [0], [0], [1], [0, 0, 1, 1], [], []>} : vector<64x64xbf16>, vector<64x128xbf16>, vector<64x128xf32> -> vector<64x128xf32>
    %c0_10 = arith.constant 0 : index
    %c0_11 = arith.constant 0 : index
    %14 = vector.load %arg5[%c0_10, %c0_11] : memref<64x1xf32, #tpu.memory_space<vmem>>, vector<64x1xf32>
    %15 = vector.broadcast %14 : vector<64x1xf32> to vector<64x128xf32>
    %16 = arith.addf %13, %15 : vector<64x128xf32>
    %cst_12 = arith.constant 0.000000e+00 : f32
    %17 = vector.broadcast %cst_12 : f32 to vector<64x128xf32>
    %18 = arith.cmpf ogt, %16, %17 : vector<64x128xf32>
    %cst_13 = arith.constant 2.000000e-01 : f32
    %19 = vector.broadcast %cst_13 : f32 to vector<64x128xf32>
    %20 = arith.mulf %19, %16 : vector<64x128xf32>
    %21 = arith.select %18, %16, %20 : vector<64x128xi1>, vector<64x128xf32>
    %c0_14 = arith.constant 0 : index
    %c0_15 = arith.constant 0 : index
    %22 = vector.load %arg6[%c0_14, %c0_15] : memref<64x1xf32, #tpu.memory_space<vmem>>, vector<64x1xf32>
    %23 = vector.broadcast %22 : vector<64x1xf32> to vector<64x128xf32>
    %24 = arith.mulf %21, %23 : vector<64x128xf32>
    %cst_16 = arith.constant dense<0.000000e+00> : vector<128xf32>
    %25 = vector.multi_reduction <add>, %24, %cst_16 [0] : vector<64x128xf32> to vector<128xf32>
    %26 = vector.shape_cast %25 : vector<128xf32> to vector<1x128xf32>
    %c0_17 = arith.constant 0 : index
    %c0_18 = arith.constant 0 : index
    %27 = memref.load %arg7[%c0_17, %c0_18] : memref<1x1xf32, #tpu.memory_space<smem>>
    %28 = vector.broadcast %27 : f32 to vector<1x128xf32>
    %29 = arith.addf %26, %28 : vector<1x128xf32>
    %30 = arith.negf %29 : vector<1x128xf32>
    %31 = math.exp %30 : vector<1x128xf32>
    %cst_19 = arith.constant 1.000000e+00 : f32
    %32 = vector.broadcast %cst_19 : f32 to vector<1x128xf32>
    %33 = arith.addf %32, %31 : vector<1x128xf32>
    %34 = arith.divf %32, %33 : vector<1x128xf32>
    %c0_20 = arith.constant 0 : index
    %c0_21 = arith.constant 0 : index
    %35 = vector.load %arg8[%c0_20, %c0_21] : memref<1x128xf32, #tpu.memory_space<vmem>>, vector<1x128xf32>
    tpu.vector_store %arg8[%c0_20, %c0_21], %34 {strides = array<i32>} : memref<1x128xf32, #tpu.memory_space<vmem>>, vector<1x128xf32>,
    return
  }
  func.func @transform_0(%arg0: i32) -> (i32, i32) {
    %c0_i32 = arith.constant 0 : i32
    %c0_i32_0 = arith.constant 0 : i32
    return %c0_i32, %arg0 : i32, i32
  }
  func.func @transform_1(%arg0: i32) -> (i32, i32) {
    %c0_i32 = arith.constant 0 : i32
    %c0_i32_0 = arith.constant 0 : i32
    %c0_i32_1 = arith.constant 0 : i32
    return %c0_i32, %c0_i32_0 : i32, i32
  }
  func.func @transform_2(%arg0: i32) -> (i32, i32) {
    %c0_i32 = arith.constant 0 : i32
    %c0_i32_0 = arith.constant 0 : i32
    %c0_i32_1 = arith.constant 0 : i32
    return %c0_i32, %c0_i32_0 : i32, i32
  }
  func.func @transform_3(%arg0: i32) -> (i32, i32) {
    %c0_i32 = arith.constant 0 : i32
    %c0_i32_0 = arith.constant 0 : i32
    %c0_i32_1 = arith.constant 0 : i32
    return %c0_i32, %c0_i32_0 : i32, i32
  }
  func.func @transform_4(%arg0: i32) -> (i32, i32) {
    %c0_i32 = arith.constant 0 : i32
    %c0_i32_0 = arith.constant 0 : i32
    %c0_i32_1 = arith.constant 0 : i32
    return %c0_i32, %c0_i32_0 : i32, i32
  }
  func.func @transform_5(%arg0: i32) -> (i32, i32) {
    %c0_i32 = arith.constant 0 : i32
    %c0_i32_0 = arith.constant 0 : i32
    %c0_i32_1 = arith.constant 0 : i32
    return %c0_i32, %c0_i32_0 : i32, i32
  }
  func.func @transform_6(%arg0: i32) -> (i32, i32) {
    %c0_i32 = arith.constant 0 : i32
    %c0_i32_0 = arith.constant 0 : i32
    %c0_i32_1 = arith.constant 0 : i32
    return %c0_i32, %c0_i32_0 : i32, i32
  }
  func.func @transform_7(%arg0: i32) -> (i32, i32) {
    %c0_i32 = arith.constant 0 : i32
    %c0_i32_0 = arith.constant 0 : i32
    return %c0_i32, %arg0 : i32, i32
  }
}

</mosaic_0001>

<bundles_post_ra>
// kernel: tpu_custom_call.1
= control target key start
LH: loop header
LB: loop body
LE: loop exit
PB: predicated region body
PF: predicated region fallthrough
CT: control target
= control target key end

     0   :  { %vm121_vm0 = vcmask 261120   ;;  %v601_v3 = vmov 0   ;;  %s768_s0 = inlined_call_operand.vmem [shape: bf16[32,128], index: 0, kind: input, shape index: {}]   ;;  %s769_s1 = inlined_call_operand.vmem [shape: bf16[64,32], index: 1, kind: input, shape index: {}]   ;;  %s770_s2 = inlined_call_operand.vmem [shape: f32[64,1], index: 2, kind: input, shape index: {}]   ;;  %s771_s3 = inlined_call_operand.vmem [shape: bf16[64,64], index: 3, kind: input, shape index: {}]   ;;  %s772_s4 = inlined_call_operand.vmem [shape: f32[64,1], index: 4, kind: input, shape index: {}]   ;;  %s773_s5 = inlined_call_operand.vmem [shape: f32[64,1], index: 5, kind: input, shape index: {}]   ;;  %s774_s6 = inlined_call_operand.<no memory space> [shape: f32[1,1], index: 6, kind: input, shape index: {}]   ;;  %s775_s7 = inlined_call_operand.hbm [shape: f32[1,128], index: 7, kind: output, shape index: {}]  }
   0x1   :  { %v563_v0 = vld [vmem:[%s768_s0] sm:$0xff]   ;;  %v564_v1 = vld [vmem:[%s768_s0 + $0x8] sm:$0xff]   ;;  %561 = vset.pattern.permute.xlu0 %v601_v3  ;;  %562 = vset.pattern.permute.xlu1 %v601_v3  ;;  %v43_v6 = vld [vmem:[%s770_s2 + $0x10] sm:$0xff] }
   0x2   :  { %531 = vmatprep.subr.bf16.mxu0 %v563_v0  ;;  %v565_v2 = vld [vmem:[%s769_s1] sm:$0xff]   ;;  %v566_v4 = vld [vmem:[%s769_s1 + $0x8] sm:$0xff]   ;;  %v567_v7 = vld [vmem:[%s769_s1 + $0x10] sm:$0xff]   ;;  %61 = vperm.xlu1 %562, %v43_v6  }
   0x3   :  { %532 = vmatpush3.bf16.msra.mxu0 %v563_v0  ;;  %535 = vmatprep.mubr.msk.bf16.mxu0 %vm121_vm0, %v565_v2  ;;  %v41_v5 = vld [vmem:[%s770_s2] sm:$0xff]  ;;  %v42_v8 = vld [vmem:[%s770_s2 + $0x8] sm:$0xff]  ;;  %v44_v9 = vld [vmem:[%s770_s2 + $0x18] sm:$0xff] }
   0x4   :  { %533 = vmatprep.subr.bf16.mxu0 %v564_v1  ;;  %51 = vperm.xlu0 %561, %v41_v5   ;;  %v45_v10 = vld [vmem:[%s770_s2 + $0x20] sm:$0xff]  ;;  %v568_v11 = vld [vmem:[%s769_s1 + $0x18] sm:$0xff]   ;;  %v46_v12 = vld [vmem:[%s770_s2 + $0x28] sm:$0xff] }
   0x5   :  { %v47_v13 = vld [vmem:[%s770_s2 + $0x30] sm:$0xff] }
   0x6   :  { %66 = vperm.xlu1 %562, %v44_v9  }
   0x7   :  { %534 = vmatpush3.bf16.msra.mxu0 %v564_v1 }
   0x8   :  { %56 = vperm.xlu0 %561, %v42_v8  }
   0xa   :  { %536 = vmatmul.mubr.msk.bf16.vlgmr.msra.gmra.mrb[0].mxu0 %vm121_vm0, %v566_v4  ;;  %76 = vperm.xlu1 %562, %v46_v12  }
   0xb   :  { %539 = vmatprep.mubr.msk.bf16.mxu0 %vm121_vm0, %v567_v7 }
   0xc   :  { %71 = vperm.xlu0 %561, %v45_v10  }
   0xd   :  { %13 = vsyncpa [#allocation4], 0  ;;  %v48_v14 = vld [vmem:[%s770_s2 + $0x38] sm:$0xff]  ;;  %v235_v15 = vld [vmem:[%s772_s4] sm:$0xff]  ;;  %vm303_vm1 = vcmask 523264   ;;  %s602_s15 = smov [#allocation3]  }
   0xe   :  { %86 = vperm.xlu1 %562, %v48_v14   ;;  %v236_v16 = vld [vmem:[%s772_s4 + $0x8] sm:$0xff]  ;;  %v237_v17 = vld [vmem:[%s772_s4 + $0x10] sm:$0xff]  ;;  %v238_v18 = vld [vmem:[%s772_s4 + $0x18] sm:$0xff]  ;;  %s490_s16 = sshll.u32 %s602_s15, 4  ;;  %s491_s16 = int_to_ptr.vmem [resolvable:$true] %s490_s16 }
   0xf   :  { %v405_v19 = vld [vmem:[%s773_s5] sm:$0xff]  ;;  %v406_v20 = vld [vmem:[%s773_s5 + $0x8] sm:$0xff]  ;;  %v407_v22 = vld [vmem:[%s773_s5 + $0x10] sm:$0xff]  ;;  %s577_s17 = scalar_lea.vmem %s491_s16, 16  ;;  %s581_s18 = scalar_lea.vmem %s491_s16, 32 }
  0x10   :  { %81 = vperm.xlu0 %561, %v47_v13   ;;  %v239_v21 = vld [vmem:[%s772_s4 + $0x20] sm:$0xff]  ;;  %v240_v23 = vld [vmem:[%s772_s4 + $0x28] sm:$0xff]  ;;  %v408_v24 = vld [vmem:[%s773_s5 + $0x18] sm:$0xff]  ;;  %p578_p0 = scmp.ne.s32.totalorder %s491_s16, %s577_s17  ;;  %p582_p1 = scmp.lt.s32.totalorder %s491_s16, %s491_s16 }
  0x11   :  { %v241_v25 = vld [vmem:[%s772_s4 + $0x30] sm:$0xff]  ;;  %v409_v26 = vld [vmem:[%s773_s5 + $0x20] sm:$0xff]  ;;  %v242_v27 = vld [vmem:[%s772_s4 + $0x38] sm:$0xff]  ;;  %p583_p2 = scmp.lt.s32.totalorder %s581_s18, %s577_s17 }
  0x12   :  { %540 = vmatmul.mubr.msk.bf16.gmra.mrb[4].mxu0 %vm121_vm0, %v568_v11  ;;  %250 = vperm.xlu1 %562, %v236_v16   ;;  %v410_v28 = vld [vmem:[%s773_s5 + $0x28] sm:$0xff]  ;;  %v411_v29 = vld [vmem:[%s773_s5 + $0x30] sm:$0xff]  ;;  %v412_v30 = vld [vmem:[%s773_s5 + $0x38] sm:$0xff] }
  0x13   :  { %v569_v31 = vld [vmem:[%s771_s3] sm:$0xff]   ;;  %v570_v12 = vld [vmem:[%s771_s3 + $0x8] sm:$0xff]   ;;  %v571_v13 = vld [vmem:[%s771_s3 + $0x10] sm:$0xff]   ;;  %p584_p3 = por %p583_p2, %p582_p1 }
  0x14   :  { %245 = vperm.xlu0 %561, %v235_v15   ;;  %551 = vmatprep.mubr.msk.bf16.mxu1 %vm303_vm1, %v569_v31  ;;  %v572_v14 = vld [vmem:[%s771_s3 + $0x18] sm:$0xff]  }
  0x15   :  { %p585_p4 = pnand %p584_p3, %p578_p0 }
  0x16   :  { %260 = vperm.xlu1 %562, %v238_v18  }
  0x18   :  { %255 = vperm.xlu0 %561, %v237_v17  }
  0x1a   :  { %420 = vperm.xlu1 %562, %v406_v20  }
  0x1c   :  { %415 = vperm.xlu0 %561, %v405_v19  }
  0x1e   :  { %425 = vperm.xlu1 %562, %v407_v22  }
  0x20   :  { %265 = vperm.xlu0 %561, %v239_v21  }
  0x22   :  { %430 = vperm.xlu1 %562, %v408_v24  }
  0x24   :  { %270 = vperm.xlu0 %561, %v240_v23  }
  0x26   :  { %435 = vperm.xlu1 %562, %v409_v26  }
  0x28   :  { %275 = vperm.xlu0 %561, %v241_v25  }
  0x2a   :  { %440 = vperm.xlu1 %562, %v410_v28  }
  0x2c   :  { %280 = vperm.xlu0 %561, %v242_v27  }
  0x2e   :  { %450 = vperm.xlu1 %562, %v412_v30  }
  0x30   :  { %445 = vperm.xlu0 %561, %v411_v29  }
  0x81   :  { %v62_v33 = vpop.permute.xlu1 %61 }
  0x83   :  { %v52_v32 = vpop.permute.xlu0 %51 }
  0x85   :  { %v67_v35 = vpop.permute.xlu1 %66 }
  0x87   :  { %v57_v34 = vpop.permute.xlu0 %56 }
  0x89   :  { %v77_v45 = vpop.permute.xlu1 %76 }
  0x8b   :  { %v72_v39 = vpop.permute.xlu0 %71 }
  0x8d   :  { %v87_v60 = vpop.permute.xlu1 %86 }
  0x8f   :  { %v82_v52 = vpop.permute.xlu0 %81 }
  0x91   :  { %v251_v16 = vpop.permute.xlu1 %250 }
  0x93   :  { %v246_v15 = vpop.permute.xlu0 %245 }
  0x95   :  { %v261_v18 = vpop.permute.xlu1 %260 }
  0x97   :  { %v256_v17 = vpop.permute.xlu0 %255 }
  0x99   :  { %v421_v20 = vpop.permute.xlu1 %420 }
  0x9b   :  { %v416_v19 = vpop.permute.xlu0 %415 }
  0x9d   :  { %v426_v22 = vpop.permute.xlu1 %425 }
  0x9f   :  { %v266_v21 = vpop.permute.xlu0 %265 }
  0xa1   :  { %v431_v27 = vpop.permute.xlu1 %430 }
  0xa3   :  { %v271_v23 = vpop.permute.xlu0 %270 }
  0xdd   :  { %v537_v36 = vpop.f32.mrb[0].mxu0 }
  0xde   :  { %v177_v37 = vadd.f32 %v537_v36, %v62_v33  ;;  %v168_v38 = vpop.f32.mrb[1].mxu0 }
  0xdf   :  { %v169_v40 = vadd.f32 %v168_v38, %v52_v32  ;;  %v538_v41 = vpop.f32.mrb[2].mxu0  ;;  %v276_v32 = vpop.permute.xlu0 %275 }
  0xe0   :  { %v209_v42 = vmul.f32 0.2, %v177_v37  ;;  %v180_v43 = vadd.f32 %v538_v41, %v67_v35  ;;  %v171_v44 = vpop.f32.mrb[3].mxu0  ;;  %vm201_vm2 = vcmp.gt.f32.partialorder %v177_v37, 0.0 }
  0xe1   :  { %v207_v46 = vmul.f32 0.2, %v169_v40  ;;  %v172_v47 = vadd.f32 %v171_v44, %v57_v34  ;;  %vm199_vm4 = vcmp.gt.f32.partialorder %v169_v40, 0.0 }
  0xe2   :  { %vm202_vm3 = vcmp.gt.f32.partialorder %v180_v43, 0.0  ;;  %v210_v48 = vmul.f32 0.2, %v180_v43  ;;  %v217_v50 = vsel %vm201_vm2, %v177_v37, %v209_v42 }
  0xe3   :  { %v208_v49 = vmul.f32 0.2, %v172_v47  ;;  %vm200_vm5 = vcmp.gt.f32.partialorder %v172_v47, 0.0  ;;  %v215_v54 = vsel %vm199_vm4, %v169_v40, %v207_v46 }
  0xe4   :  { %v218_v51 = vsel %vm202_vm3, %v180_v43, %v210_v48 }
  0xe5   :  { %v541_v53 = vpop.f32.mrb[4].mxu0  ;;  %v216_v55 = vsel %vm200_vm5, %v172_v47, %v208_v49  ;;  %v232_v56 = vpack.c.bf16 %v218_v51, %v217_v50  ;;  %v281_v47 = vpop.permute.xlu0 %280 }
  0xe6   :  { %v193_v57 = vadd.f32 %v541_v53, %v82_v52  ;;  %v184_v58 = vpop.f32.mrb[5].mxu0  ;;  %v231_v59 = vpack.c.bf16 %v216_v55, %v215_v54 }
  0xe7   :  { %v185_v61 = vadd.f32 %v184_v58, %v72_v39  ;;  %v542_v62 = vpop.f32.mrb[6].mxu0  ;;  %v436_v39 = vpop.permute.xlu1 %435 }
  0xe8   :  { %v213_v63 = vmul.f32 0.2, %v193_v57  ;;  %v196_v0 = vadd.f32 %v542_v62, %v87_v60  ;;  %v187_v1 = vpop.f32.mrb[7].mxu0  ;;  %543 = vmatprep.subr.bf16.mxu1 %v231_v59  ;;  %vm205_vm6 = vcmp.gt.f32.partialorder %v193_v57, 0.0 }
  0xe9   :  { %v211_v2 = vmul.f32 0.2, %v185_v61  ;;  %v188_v3 = vadd.f32 %v187_v1, %v77_v45  ;;  %544 = vmatpush3.bf16.msra.mxu1 %v231_v59  ;;  %vm203_vm7 = vcmp.gt.f32.partialorder %v185_v61, 0.0 }
  0xea   :  { %vm206_vm8 = vcmp.gt.f32.partialorder %v196_v0, 0.0  ;;  %v214_v4 = vmul.f32 0.2, %v196_v0  ;;  %545 = vmatprep.subr.bf16.mxu1 %v232_v56  ;;  %v221_v6 = vsel %vm205_vm6, %v193_v57, %v213_v63 }
  0xeb   :  { %vm204_vm9 = vcmp.gt.f32.partialorder %v188_v3, 0.0  ;;  %v212_v5 = vmul.f32 0.2, %v188_v3  ;;  %v219_v8 = vsel %vm203_vm7, %v185_v61, %v211_v2  ;;  %v441_v60 = vpop.permute.xlu1 %440 }
  0xec   :  { %v222_v7 = vsel %vm206_vm8, %v196_v0, %v214_v4 }
  0xed   :  { %546 = vmatpush3.bf16.msra.mxu1 %v232_v56  ;;  %v220_v9 = vsel %vm204_vm9, %v188_v3, %v212_v5  ;;  %v234_v10 = vpack.c.bf16 %v222_v7, %v221_v6  ;;  %v446_v6 = vpop.permute.xlu0 %445 }
  0xee   :  { %v233_v11 = vpack.c.bf16 %v220_v9, %v219_v8 }
  0xf0   :  { %547 = vmatprep.subr.bf16.mxu1 %v233_v11 }
  0xf1   :  { %548 = vmatpush3.bf16.msra.mxu1 %v233_v11 }
  0xf2   :  { %549 = vmatprep.subr.bf16.mxu1 %v234_v10 }
  0xf5   :  { %550 = vmatpush3.bf16.msra.mxu1 %v234_v10  ;;  %v451_v10 = vpop.permute.xlu1 %450 }
  0xf8   :  { %552 = vmatmul.mubr.msk.bf16.vlgmr.msra.gmra.mrb[0].mxu1 %vm303_vm1, %v570_v12 }
  0xf9   :  { %555 = vmatprep.mubr.msk.bf16.mxu1 %vm303_vm1, %v571_v13 }
 0x100   :  { %556 = vmatmul.mubr.msk.bf16.gmra.mrb[4].mxu1 %vm303_vm1, %v572_v14 }
 0x1cb   :  { %v553_v24 = vpop.f32.mrb[0].mxu1 }
 0x1cc   :  { %v359_v25 = vadd.f32 %v553_v24, %v256_v17  ;;  %v350_v26 = vpop.f32.mrb[1].mxu1 }
 0x1cd   :  { %v351_v28 = vadd.f32 %v350_v26, %v246_v15  ;;  %v554_v29 = vpop.f32.mrb[2].mxu1 }
 0x1ce   :  { %v362_v30 = vadd.f32 %v554_v29, %v261_v18  ;;  %v353_v31 = vpop.f32.mrb[3].mxu1  ;;  %v391_v33 = vmul.f32 0.2, %v359_v25  ;;  %vm383_vm11 = vcmp.gt.f32.partialorder %v359_v25, 0.0 }
 0x1cf   :  { %vm381_vm10 = vcmp.gt.f32.partialorder %v351_v28, 0.0  ;;  %v389_v34 = vmul.f32 0.2, %v351_v28  ;;  %v354_v35 = vadd.f32 %v353_v31, %v251_v16 }
 0x1d0   :  { %v392_v37 = vmul.f32 0.2, %v362_v30  ;;  %vm384_vm13 = vcmp.gt.f32.partialorder %v362_v30, 0.0  ;;  %v399_v40 = vsel %vm383_vm11, %v359_v25, %v391_v33 }
 0x1d1   :  { %v397_v36 = vsel %vm381_vm10, %v351_v28, %v389_v34  ;;  %vm382_vm12 = vcmp.gt.f32.partialorder %v354_v35, 0.0  ;;  %v390_v38 = vmul.f32 0.2, %v354_v35  ;;  %v455_v51 = vmul.f32 %v426_v22, %v399_v40 }
 0x1d2   :  { %v453_v43 = vmul.f32 %v416_v19, %v397_v36  ;;  %v400_v48 = vsel %vm384_vm13, %v362_v30, %v392_v37  ;;  %v475_v19 = vstv %s774_s6 }
 0x1d3   :  { %v398_v41 = vsel %vm382_vm12, %v354_v35, %v390_v38  ;;  %v557_v42 = vpop.f32.mrb[4].mxu1  ;;  %v456_v58 = vmul.f32 %v431_v27, %v400_v48 }
 0x1d4   :  { %v454_v44 = vmul.f32 %v421_v20, %v398_v41  ;;  %v375_v45 = vadd.f32 %v557_v42, %v276_v32  ;;  %v366_v46 = vpop.f32.mrb[5].mxu1 }
 0x1d5   :  { %v367_v49 = vadd.f32 %v366_v46, %v266_v21  ;;  %v558_v50 = vpop.f32.mrb[6].mxu1 }
 0x1d6   :  { %v461_v52 = vadd.f32 %v454_v44, %v453_v43  ;;  %v378_v53 = vadd.f32 %v558_v50, %v281_v47  ;;  %v369_v54 = vpop.f32.mrb[7].mxu1  ;;  %v395_v55 = vmul.f32 0.2, %v375_v45  ;;  %vm387_vm15 = vcmp.gt.f32.partialorder %v375_v45, 0.0 }
 0x1d7   :  { %vm385_vm14 = vcmp.gt.f32.partialorder %v367_v49, 0.0  ;;  %v393_v56 = vmul.f32 0.2, %v367_v49  ;;  %v370_v57 = vadd.f32 %v369_v54, %v271_v23 }
 0x1d8   :  { %v462_v59 = vadd.f32 %v461_v52, %v455_v51  ;;  %v396_v62 = vmul.f32 0.2, %v378_v53  ;;  %vm388_vm1 = vcmp.gt.f32.partialorder %v378_v53, 0.0  ;;  %v403_v2 = vsel %vm387_vm15, %v375_v45, %v395_v55 }
 0x1d9   :  { %v401_v61 = vsel %vm385_vm14, %v367_v49, %v393_v56  ;;  %vm386_vm0 = vcmp.gt.f32.partialorder %v370_v57, 0.0  ;;  %v394_v63 = vmul.f32 0.2, %v370_v57  ;;  %v459_v8 = vmul.f32 %v446_v6, %v403_v2 }
 0x1da   :  { %v457_v0 = vmul.f32 %v436_v39, %v401_v61  ;;  %v463_v1 = vadd.f32 %v462_v59, %v456_v58  ;;  %v404_v7 = vsel %vm388_vm1, %v378_v53, %v396_v62 }
 0x1db   :  { %v402_v3 = vsel %vm386_vm0, %v370_v57, %v394_v63  ;;  %v460_v11 = vmul.f32 %v451_v10, %v404_v7 }
 0x1dc   :  { %v464_v4 = vadd.f32 %v463_v1, %v457_v0  ;;  %v458_v5 = vmul.f32 %v441_v60, %v402_v3 }
 0x1de   :  { %v465_v9 = vadd.f32 %v464_v4, %v458_v5 }
 0x1e0   :  { %v466_v12 = vadd.f32 %v465_v9, %v459_v8 }
 0x1e2   :  { %v467_v13 = vadd.f32 %v466_v12, %v460_v11 }
 0x1e4   :  { %v468_v14 = vrot.slane %v467_v13, 4 }
 0x1e6   :  { %v469_v15 = vadd.f32 %v468_v14, %v467_v13 }
 0x1e8   :  { %v470_v16 = vrot.slane %v469_v15, 2 }
 0x1ea   :  { %v471_v17 = vadd.f32 %v470_v16, %v469_v15 }
 0x1ec   :  { %v472_v18 = vrot.slane %v471_v17, 1 }
 0x1ee   :  { %v473_v20 = vadd.f32 %v472_v18, %v471_v17 }
 0x1f0   :  { %v476_v21 = vadd.f32 %v475_v19, %v473_v20 }
 0x1f2   :  { %v516_v22 = vmul.f32 -1.442695, %v476_v21 }
 0x1f4   :  { %573 = vpow2.f32 %v516_v22 }
 0x1fe   :  { %v574_v23 = vpop.eup %573 }
 0x1ff   :  { %v480_v24 = vadd.f32 1.0, %v574_v23 }
 0x201   :  { %575 = vrcp.f32 %v480_v24 }
 0x20b   :  { %v576_v25 = vpop.eup %575 }
 0x20c   :  { %483 = vst [vmem:[#allocation3] sm:$0x1] %v576_v25 }
 0x20d   :  { %588 = shalt.err (!%p585_p4)
}
 0x20e   :  { %s589_s20 = scalar_lea.hbm %s775_s7, 16 }
 0x20f   :  { %p590_p5 = scmp.ne.s32.totalorder %s775_s7, %s589_s20  ;;  %p593_p6 = scmp.lt.u32.totalorder %s589_s20, %s775_s7 }
 0x211   :  { %p595_p7 = pnand %p593_p6, %p590_p5 }
 0x213   :  { %598 = shalt.err (!%p595_p7)
}
 0x214   :  { %493 = dma.vmem_to_hbm [thread:$0]  %s491_s16, 16, %s775_s7, [#allocation4]  }
 0x215   :  { %599 = dma.done.wait [#allocation4], 16  }
 0x216   :  { %600 = vsyncadd [#allocation4], 4294967280 }
 0x217   :  { %497 = vsyncpa [#allocation4], 1 }

</bundles_post_ra>
